<compile_context>
chip_gen: v7x
topology: tpu7x:2x2x1
jax: 0.10.0
libtpu: 0.0.40
codegen_flags: <defaults>
</compile_context>

<pallas_src>
import functools

import jax
import jax.numpy as jnp
import numpy as np
from jax.experimental import pallas as pl
from jax.experimental.pallas import tpu as pltpu

_MASK_VAL = -9e15   # "connectivity_mask" value from the reference GAT (Python float literal)


# ----------------------------- fused ConvSTGATBlock kernel --------------------------------
def _conv_stgat_kernel(h_ref, adj_ref, w_ref, asrc_ref, adst_ref, bigmask_ref,
                       band2_ref, b2_ref, band3_ref, b3_ref, out_ref,
                       *, B, N, n_heads, slope, k2, k3):
    BH = B * n_heads

    # ------------------- GAT: shared projection + batched per-head attention --------------
    ht = jnp.dot(h_ref[...], w_ref[...], preferred_element_type=jnp.float32)    # (B*N, Fout)

    nt = (((1,), (1,)), ((), ()))      # contract last dim vs last dim ("q @ k^T" pattern)
    src_h = jax.lax.dot_general(asrc_ref[...], ht, nt,
                                preferred_element_type=jnp.float32)              # (H, B*N)
    dst_h = jax.lax.dot_general(adst_ref[...], ht, nt,
                                preferred_element_type=jnp.float32)              # (H, B*N)
    # Regroup scores to (B*H, N) with rows ordered g = b*H + h (lane slices + sublane concat;
    # no transposes / unaligned reshapes needed).
    src_bh = jnp.concatenate([src_h[:, b * N:(b + 1) * N] for b in range(B)], axis=0)
    dst_bh = jnp.concatenate([dst_h[:, b * N:(b + 1) * N] for b in range(B)], axis=0)

    # ONE vectorized LeakyReLU / connectivity-mask / stable-softmax pass for all (b, head).
    e = src_bh[:, :, None] + dst_bh[:, None, :]                                  # (B*H, N, N)
    e = jnp.where(e > 0.0, e, slope * e)                                         # LeakyReLU
    e = jnp.where((adj_ref[...] > 0.0)[None, :, :], e, _MASK_VAL)                # adj compared once
    m = jnp.max(e, axis=-1, keepdims=True)
    p = jnp.exp(e - m)
    s = jnp.sum(p, axis=-1, keepdims=True)
    attn = p * pl.reciprocal(s, approx=True)                                     # (B*H, N, N)

    # Single block-diagonal MXU matmul: every graph's GAT output, heads already concatenated
    # along features:  (N, B*H*N) @ (B*H*N, B*Fout) -> (N, B*Fout).
    a_cat = jnp.concatenate([attn[g] for g in range(BH)], axis=1)                # (N, B*H*N)
    ht_rep = jnp.concatenate(
        [jnp.tile(ht[b * N:(b + 1) * N, :], (n_heads, 1)) for b in range(B)], axis=0)  # (B*H*N, Fout)
    bd = jnp.tile(ht_rep, (1, B)) * bigmask_ref[...]                             # block-diag (B*H*N, B*Fout)
    gat = jnp.dot(a_cat, bd, preferred_element_type=jnp.float32)                 # (N, B*Fout)
    # gat[:, c*Fout + f] == GAT output of graph c, feature f  (conv_2D input, channel c).

    # ------------- conv_2D: k2 row-shifted MXU matmuls against banded weight mats ----------
    h2 = N - k2 + 1
    acc2 = jnp.dot(gat[0:h2, :], band2_ref[0], preferred_element_type=jnp.float32)
    for di in range(1, k2):
        acc2 = acc2 + jnp.dot(gat[di:di + h2, :], band2_ref[di],
                              preferred_element_type=jnp.float32)
    y2 = acc2 + b2_ref[...]                                                      # (h2, cout2*w2o)

    # -------- conv_3D with depth-1 kernel (== second 2D conv); squeeze(1) is implicit ------
    h3 = h2 - k3 + 1
    acc3 = jnp.dot(y2[0:h3, :], band3_ref[0], preferred_element_type=jnp.float32)
    for di in range(1, k3):
        acc3 = acc3 + jnp.dot(y2[di:di + h3, :], band3_ref[di],
                              preferred_element_type=jnp.float32)
    out_ref[...] = acc3 + b3_ref[...]                                            # (h3, cout3*w3o)


# ----------------------------- wrapper -----------------------------------------------------
def conv_stgat_block_forward(h, adj, params, *, leaky_relu_slope=0.2):
    B, N, Fin = h.shape
    n_heads, n_hidden = params["a_src"].shape
    Fout = n_heads * n_hidden

    w2, b2 = params["w2"], params["b2"]
    w3, b3 = params["w3"], params["b3"]
    cout2, cin2, k2, _ = w2.shape
    cout3, cin3, kd3, k3, _ = w3.shape
    assert cin2 == B and cin3 == cout2 and kd3 == 1

    h2, w2o = N - k2 + 1, Fout - k2 + 1
    h3, w3o = h2 - k3 + 1, w2o - k3 + 1

    f32 = jnp.float32
    # ---- GAT helper matrices (host-side parameter/layout preprocessing; tiny, done once) ---
    eye_h = jnp.eye(n_heads, dtype=f32)
    a_src_mat = (eye_h[:, :, None] * params["a_src"][None, :, :]).reshape(n_heads, Fout)
    a_dst_mat = (eye_h[:, :, None] * params["a_dst"][None, :, :]).reshape(n_heads, Fout)
    head_mask = jnp.repeat(eye_h, n_hidden, axis=1)                  # (H, Fout)
    blk = jnp.repeat(head_mask, N, axis=0)                           # (H*N, Fout)
    bigmask = jnp.kron(jnp.eye(B, dtype=f32), blk)                   # (B*H*N, B*Fout) block-diag

    # ---- conv weights lowered to banded matrices:  conv == sum_d (rows shifted by d) @ band[d]
    # band2[d, c*Fout+f, o*w2o+j] = w2[o, c, d, f-j]  (0 <= f-j < k2)
    shift2 = (jnp.arange(Fout)[None, :, None]
              == jnp.arange(k2)[:, None, None] + jnp.arange(w2o)[None, None, :]).astype(f32)
    band2 = jnp.einsum("ocde,efj->dcfoj", w2.astype(f32), shift2).reshape(
        k2, cin2 * Fout, cout2 * w2o)
    shift3 = (jnp.arange(w2o)[None, :, None]
              == jnp.arange(k3)[:, None, None] + jnp.arange(w3o)[None, None, :]).astype(f32)
    band3 = jnp.einsum("ocde,efj->dcfoj", w3[:, :, 0].astype(f32), shift3).reshape(
        k3, cin3 * w2o, cout3 * w3o)
    b2row = jnp.repeat(b2.astype(f32), w2o)[None, :]                 # (1, cout2*w2o)
    b3row = jnp.repeat(b3.astype(f32), w3o)[None, :]                 # (1, cout3*w3o)

    h2d = h.astype(f32).reshape(B * N, Fin)                          # free layout reshape (XLA)
    adj_f = adj.astype(f32)

    kernel = functools.partial(_conv_stgat_kernel, B=B, N=N, n_heads=n_heads,
                               slope=float(leaky_relu_slope), k2=k2, k3=k3)

    flops = int(2 * B * N * Fin * Fout                               # projection
                + 4 * B * N * Fout * n_heads                         # src/dst scores
                + 2 * N * (B * n_heads * N) * (B * Fout)             # block-diag attn matmul
                + 2 * k2 * h2 * (B * Fout) * (cout2 * w2o)           # conv_2D banded matmuls
                + 2 * k3 * h3 * (cout2 * w2o) * (cout3 * w3o))       # conv_3D banded matmuls
    bytes_accessed = int(4 * (h2d.size + adj_f.size + params["W"].size
                              + a_src_mat.size + a_dst_mat.size + bigmask.size
                              + band2.size + b2row.size + band3.size + b3row.size
                              + h3 * cout3 * w3o))

    vmem_specs = [pl.BlockSpec(memory_space=pltpu.MemorySpace.VMEM) for _ in range(10)]
    out2d = pl.pallas_call(
        kernel,
        out_shape=jax.ShapeDtypeStruct((h3, cout3 * w3o), jnp.float32),
        in_specs=vmem_specs,
        out_specs=pl.BlockSpec(memory_space=pltpu.MemorySpace.VMEM),
        cost_estimate=pl.CostEstimate(flops=flops,
                                      transcendentals=int(B * n_heads * N * N),
                                      bytes_accessed=bytes_accessed),
    )(h2d, adj_f, params["W"].astype(f32), a_src_mat, a_dst_mat,
      bigmask, band2, b2row, band3, b3row)

    # (h3, cout3*w3o) -> (cout3, h3, w3o): pure layout plumbing outside the kernel (free).
    return out2d.reshape(h3, cout3, w3o).transpose(1, 0, 2)


# ----------------------------- pure-JAX reference (for verification) ----------------------
def ref_block(h, adj, W, a_src, a_dst, w2, b2, w3, b3, slope):
    B, N, Fin = h.shape
    Hh, nh = a_src.shape
    ht = (h.reshape(B * N, Fin) @ W).reshape(B, N, Hh, nh).transpose(0, 2, 1, 3)  # (B,H,N,nh)
    src = jnp.einsum("bhnd,hd->bhn", ht, a_src)[:, :, :, None]
    dst = jnp.einsum("bhnd,hd->bhn", ht, a_dst)[:, :, None, :]
    e = src + dst
    e = jnp.where(e > 0, e, slope * e)
    e = jnp.where(adj[None, None] > 0, e, _MASK_VAL)
    attn = jax.nn.softmax(e, axis=-1)
    gat = jnp.einsum("bhij,bhjd->bhid", attn, ht).transpose(0, 2, 1, 3).reshape(B, N, Hh * nh)
    y2 = jax.lax.conv_general_dilated(gat[None], w2, (1, 1), "VALID",
                                      dimension_numbers=("NCHW", "OIHW", "NCHW"))[0]
    y2 = y2 + b2[:, None, None]
    y3 = jax.lax.conv_general_dilated(y2[None], w3[:, :, 0], (1, 1), "VALID",
                                      dimension_numbers=("NCHW", "OIHW", "NCHW"))[0]
    y3 = y3 + b3[:, None, None]
    return y3


if __name__ == "__main__":
    # Module config (small, self-consistent):
    #   GAT_in_features=8, GAT_out_features=16, GAT_n_heads=4, concat=True
    #   conv_2D: in=2 (== B), out=3, kernel=3
    #   conv_3D: in=3, out=4, kernel=(1,3,3)
    B, N = 2, 16
    GAT_in, GAT_out, n_heads = 8, 16, 4
    n_hidden = GAT_out // n_heads
    C2_in, C2_out, K2 = B, 3, 3
    C3_in, C3_out = C2_out, 4
    slope = 0.2

    key = jax.random.PRNGKey(0)
    ks = jax.random.split(key, 10)
    h = jax.random.normal(ks[0], (B, N, GAT_in), jnp.float32)
    adj = (jax.random.uniform(ks[1], (N, N)) > 0.5).astype(jnp.float32)
    adj = jnp.maximum(adj, jnp.eye(N, dtype=jnp.float32))   # self-loops (softmax rows never empty)

    params = {
        "W":     0.3 * jax.random.normal(ks[2], (GAT_in, GAT_out), jnp.float32),
        "a_src": 0.3 * jax.random.normal(ks[3], (n_heads, n_hidden), jnp.float32),
        "a_dst": 0.3 * jax.random.normal(ks[4], (n_heads, n_hidden), jnp.float32),
        "w2":    0.1 * jax.random.normal(ks[5], (C2_out, C2_in, K2, K2), jnp.float32),
        "b2":    0.1 * jax.random.normal(ks[6], (C2_out,), jnp.float32),
        "w3":    0.1 * jax.random.normal(ks[7], (C3_out, C3_in, 1, 3, 3), jnp.float32),
        "b3":    0.1 * jax.random.normal(ks[8], (C3_out,), jnp.float32),
    }

    out = conv_stgat_block_forward(h, adj, params, leaky_relu_slope=slope)
    out = jax.block_until_ready(out)
    assert out.shape == (C3_out, N - K2 + 1 - 2, GAT_out - K2 + 1 - 2), out.shape  # (4, 12, 12)

    ref = ref_block(h, adj, params["W"], params["a_src"], params["a_dst"],
                    params["w2"], params["b2"], params["w3"], params["b3"], slope)
    np.testing.assert_allclose(np.asarray(out), np.asarray(ref), rtol=2e-2, atol=2e-2)

    print("KERNEL_OK")
</pallas_src>

<mosaic_0001>
module attributes {stable_mosaic.version = 11 : i64} {
  func.func @_conv_stgat_kernel(%arg0: memref<32x8xf32, #tpu.memory_space<vmem>>, %arg1: memref<16x16xf32, #tpu.memory_space<vmem>>, %arg2: memref<8x16xf32, #tpu.memory_space<vmem>>, %arg3: memref<4x16xf32, #tpu.memory_space<vmem>>, %arg4: memref<4x16xf32, #tpu.memory_space<vmem>>, %arg5: memref<128x32xf32, #tpu.memory_space<vmem>>, %arg6: memref<3x32x42xf32, #tpu.memory_space<vmem>>, %arg7: memref<1x42xf32, #tpu.memory_space<vmem>>, %arg8: memref<3x42x48xf32, #tpu.memory_space<vmem>>, %arg9: memref<1x48xf32, #tpu.memory_space<vmem>>, %arg10: memref<12x48xf32, #tpu.memory_space<vmem>>) attributes {dimension_semantics = [], scalar_prefetch = 0 : i64, scratch_operands = 0 : i64, tpu.core_type = #tpu.core_type<tc>} {
    %c0 = arith.constant 0 : index
    %c0_0 = arith.constant 0 : index
    %0 = vector.load %arg0[%c0, %c0_0] : memref<32x8xf32, #tpu.memory_space<vmem>>, vector<32x8xf32>
    %c0_1 = arith.constant 0 : index
    %c0_2 = arith.constant 0 : index
    %1 = vector.load %arg2[%c0_1, %c0_2] : memref<8x16xf32, #tpu.memory_space<vmem>>, vector<8x16xf32>
    %cst = arith.constant dense<0.000000e+00> : vector<32x16xf32>
    %2 = tpu.matmul %0, %1, %cst {dimension_numbers = #tpu.dot_dimension_numbers<[1], [0], [0], [1], [0, 0, 1, 1], [], []>} : vector<32x8xf32>, vector<8x16xf32>, vector<32x16xf32> -> vector<32x16xf32>
    %c0_3 = arith.constant 0 : index
    %c0_4 = arith.constant 0 : index
    %3 = vector.load %arg3[%c0_3, %c0_4] : memref<4x16xf32, #tpu.memory_space<vmem>>, vector<4x16xf32>
    %cst_5 = arith.constant dense<0.000000e+00> : vector<4x32xf32>
    %4 = tpu.matmul %3, %2, %cst_5 {dimension_numbers = #tpu.dot_dimension_numbers<[1], [1], [0], [0], [0, 0, 1, 0], [], []>} : vector<4x16xf32>, vector<32x16xf32>, vector<4x32xf32> -> vector<4x32xf32>
    %c0_6 = arith.constant 0 : index
    %c0_7 = arith.constant 0 : index
    %5 = vector.load %arg4[%c0_6, %c0_7] : memref<4x16xf32, #tpu.memory_space<vmem>>, vector<4x16xf32>
    %cst_8 = arith.constant dense<0.000000e+00> : vector<4x32xf32>
    %6 = tpu.matmul %5, %2, %cst_8 {dimension_numbers = #tpu.dot_dimension_numbers<[1], [1], [0], [0], [0, 0, 1, 0], [], []>} : vector<4x16xf32>, vector<32x16xf32>, vector<4x32xf32> -> vector<4x32xf32>
    %7 = vector.extract_strided_slice %4 {offsets = [0, 0], sizes = [4, 16], strides = [1, 1]} : vector<4x32xf32> to vector<4x16xf32>
    %8 = vector.extract_strided_slice %4 {offsets = [0, 16], sizes = [4, 16], strides = [1, 1]} : vector<4x32xf32> to vector<4x16xf32>
    %9 = tpu.concatenate %7, %8 in 0 : vector<4x16xf32>, vector<4x16xf32> -> vector<8x16xf32>
    %10 = vector.extract_strided_slice %6 {offsets = [0, 0], sizes = [4, 16], strides = [1, 1]} : vector<4x32xf32> to vector<4x16xf32>
    %11 = vector.extract_strided_slice %6 {offsets = [0, 16], sizes = [4, 16], strides = [1, 1]} : vector<4x32xf32> to vector<4x16xf32>
    %12 = tpu.concatenate %10, %11 in 0 : vector<4x16xf32>, vector<4x16xf32> -> vector<8x16xf32>
    %13 = vector.shape_cast %9 : vector<8x16xf32> to vector<8x16x1xf32>
    %14 = vector.shape_cast %12 : vector<8x16xf32> to vector<8x1x16xf32>
    %15 = vector.broadcast %13 : vector<8x16x1xf32> to vector<8x16x16xf32>
    %16 = vector.broadcast %14 : vector<8x1x16xf32> to vector<8x16x16xf32>
    %17 = arith.addf %15, %16 : vector<8x16x16xf32>
    %cst_9 = arith.constant 0.000000e+00 : f32
    %18 = vector.broadcast %cst_9 : f32 to vector<8x16x16xf32>
    %19 = arith.cmpf ogt, %17, %18 : vector<8x16x16xf32>
    %cst_10 = arith.constant 2.000000e-01 : f32
    %20 = vector.broadcast %cst_10 : f32 to vector<8x16x16xf32>
    %21 = arith.mulf %20, %17 : vector<8x16x16xf32>
    %22 = arith.select %19, %17, %21 : vector<8x16x16xi1>, vector<8x16x16xf32>
    %c0_11 = arith.constant 0 : index
    %c0_12 = arith.constant 0 : index
    %23 = vector.load %arg1[%c0_11, %c0_12] : memref<16x16xf32, #tpu.memory_space<vmem>>, vector<16x16xf32>
    %cst_13 = arith.constant 0.000000e+00 : f32
    %24 = vector.broadcast %cst_13 : f32 to vector<16x16xf32>
    %25 = arith.cmpf ogt, %23, %24 : vector<16x16xf32>
    %26 = vector.shape_cast %25 : vector<16x16xi1> to vector<1x16x16xi1>
    %cst_14 = arith.constant -9.000000e+15 : f32
    %27 = vector.shape_cast %26 : vector<1x16x16xi1> to vector<1x16x16xi1>
    %28 = vector.broadcast %27 : vector<1x16x16xi1> to vector<8x16x16xi1>
    %29 = vector.broadcast %cst_14 : f32 to vector<8x16x16xf32>
    %30 = arith.select %28, %22, %29 : vector<8x16x16xi1>, vector<8x16x16xf32>
    %cst_15 = arith.constant dense<0xFF800000> : vector<8x16xf32>
    %31 = vector.multi_reduction <maximumf>, %30, %cst_15 [2] : vector<8x16x16xf32> to vector<8x16xf32>
    %32 = vector.shape_cast %31 : vector<8x16xf32> to vector<8x16x1xf32>
    %33 = vector.broadcast %32 : vector<8x16x1xf32> to vector<8x16x16xf32>
    %34 = arith.subf %30, %33 : vector<8x16x16xf32>
    %35 = math.exp %34 : vector<8x16x16xf32>
    %cst_16 = arith.constant dense<0.000000e+00> : vector<8x16xf32>
    %36 = vector.multi_reduction <add>, %35, %cst_16 [2] : vector<8x16x16xf32> to vector<8x16xf32>
    %37 = vector.shape_cast %36 : vector<8x16xf32> to vector<8x16x1xf32>
    %38 = tpu.reciprocal %37 {approx = true} : vector<8x16x1xf32> -> vector<8x16x1xf32>
    %39 = vector.broadcast %38 : vector<8x16x1xf32> to vector<8x16x16xf32>
    %40 = arith.mulf %35, %39 : vector<8x16x16xf32>
    %41 = vector.extract_strided_slice %40 {offsets = [0, 0, 0], sizes = [1, 16, 16], strides = [1, 1, 1]} : vector<8x16x16xf32> to vector<1x16x16xf32>
    %42 = vector.shape_cast %41 : vector<1x16x16xf32> to vector<16x16xf32>
    %43 = vector.extract_strided_slice %40 {offsets = [1, 0, 0], sizes = [1, 16, 16], strides = [1, 1, 1]} : vector<8x16x16xf32> to vector<1x16x16xf32>
    %44 = vector.shape_cast %43 : vector<1x16x16xf32> to vector<16x16xf32>
    %45 = vector.extract_strided_slice %40 {offsets = [2, 0, 0], sizes = [1, 16, 16], strides = [1, 1, 1]} : vector<8x16x16xf32> to vector<1x16x16xf32>
    %46 = vector.shape_cast %45 : vector<1x16x16xf32> to vector<16x16xf32>
    %47 = vector.extract_strided_slice %40 {offsets = [3, 0, 0], sizes = [1, 16, 16], strides = [1, 1, 1]} : vector<8x16x16xf32> to vector<1x16x16xf32>
    %48 = vector.shape_cast %47 : vector<1x16x16xf32> to vector<16x16xf32>
    %49 = vector.extract_strided_slice %40 {offsets = [4, 0, 0], sizes = [1, 16, 16], strides = [1, 1, 1]} : vector<8x16x16xf32> to vector<1x16x16xf32>
    %50 = vector.shape_cast %49 : vector<1x16x16xf32> to vector<16x16xf32>
    %51 = vector.extract_strided_slice %40 {offsets = [5, 0, 0], sizes = [1, 16, 16], strides = [1, 1, 1]} : vector<8x16x16xf32> to vector<1x16x16xf32>
    %52 = vector.shape_cast %51 : vector<1x16x16xf32> to vector<16x16xf32>
    %53 = vector.extract_strided_slice %40 {offsets = [6, 0, 0], sizes = [1, 16, 16], strides = [1, 1, 1]} : vector<8x16x16xf32> to vector<1x16x16xf32>
    %54 = vector.shape_cast %53 : vector<1x16x16xf32> to vector<16x16xf32>
    %55 = vector.extract_strided_slice %40 {offsets = [7, 0, 0], sizes = [1, 16, 16], strides = [1, 1, 1]} : vector<8x16x16xf32> to vector<1x16x16xf32>
    %56 = vector.shape_cast %55 : vector<1x16x16xf32> to vector<16x16xf32>
    %57 = tpu.concatenate %42, %44, %46, %48, %50, %52, %54, %56 in 1 : vector<16x16xf32>, vector<16x16xf32>, vector<16x16xf32>, vector<16x16xf32>, vector<16x16xf32>, vector<16x16xf32>, vector<16x16xf32>, vector<16x16xf32> -> vector<16x128xf32>
    %58 = vector.extract_strided_slice %2 {offsets = [0, 0], sizes = [16, 16], strides = [1, 1]} : vector<32x16xf32> to vector<16x16xf32>
    %59 = tpu.concatenate %58, %58, %58, %58 in 0 : vector<16x16xf32>, vector<16x16xf32>, vector<16x16xf32>, vector<16x16xf32> -> vector<64x16xf32>
    %60 = vector.extract_strided_slice %2 {offsets = [16, 0], sizes = [16, 16], strides = [1, 1]} : vector<32x16xf32> to vector<16x16xf32>
    %61 = tpu.concatenate %60, %60, %60, %60 in 0 : vector<16x16xf32>, vector<16x16xf32>, vector<16x16xf32>, vector<16x16xf32> -> vector<64x16xf32>
    %62 = tpu.concatenate %59, %61 in 0 : vector<64x16xf32>, vector<64x16xf32> -> vector<128x16xf32>
    %63 = tpu.concatenate %62, %62 in 1 : vector<128x16xf32>, vector<128x16xf32> -> vector<128x32xf32>
    %c0_17 = arith.constant 0 : index
    %c0_18 = arith.constant 0 : index
    %64 = vector.load %arg5[%c0_17, %c0_18] : memref<128x32xf32, #tpu.memory_space<vmem>>, vector<128x32xf32>
    %65 = arith.mulf %63, %64 : vector<128x32xf32>
    %cst_19 = arith.constant dense<0.000000e+00> : vector<16x32xf32>
    %66 = tpu.matmul %57, %65, %cst_19 {dimension_numbers = #tpu.dot_dimension_numbers<[1], [0], [0], [1], [0, 0, 1, 1], [], []>} : vector<16x128xf32>, vector<128x32xf32>, vector<16x32xf32> -> vector<16x32xf32>
    %67 = vector.extract_strided_slice %66 {offsets = [0, 0], sizes = [14, 32], strides = [1, 1]} : vector<16x32xf32> to vector<14x32xf32>
    %c0_20 = arith.constant 0 : index
    %c0_21 = arith.constant 0 : index
    %c0_22 = arith.constant 0 : index
    %68 = vector.load %arg6[%c0_20, %c0_21, %c0_22] : memref<3x32x42xf32, #tpu.memory_space<vmem>>, vector<1x32x42xf32>
    %69 = vector.shape_cast %68 : vector<1x32x42xf32> to vector<32x42xf32>
    %cst_23 = arith.constant dense<0.000000e+00> : vector<14x42xf32>
    %70 = tpu.matmul %67, %69, %cst_23 {dimension_numbers = #tpu.dot_dimension_numbers<[1], [0], [0], [1], [0, 0, 1, 1], [], []>} : vector<14x32xf32>, vector<32x42xf32>, vector<14x42xf32> -> vector<14x42xf32>
    %71 = vector.extract_strided_slice %66 {offsets = [1, 0], sizes = [14, 32], strides = [1, 1]} : vector<16x32xf32> to vector<14x32xf32>
    %c1 = arith.constant 1 : index
    %c0_24 = arith.constant 0 : index
    %c0_25 = arith.constant 0 : index
    %72 = vector.load %arg6[%c1, %c0_24, %c0_25] : memref<3x32x42xf32, #tpu.memory_space<vmem>>, vector<1x32x42xf32>
    %73 = vector.shape_cast %72 : vector<1x32x42xf32> to vector<32x42xf32>
    %cst_26 = arith.constant dense<0.000000e+00> : vector<14x42xf32>
    %74 = tpu.matmul %71, %73, %cst_26 {dimension_numbers = #tpu.dot_dimension_numbers<[1], [0], [0], [1], [0, 0, 1, 1], [], []>} : vector<14x32xf32>, vector<32x42xf32>, vector<14x42xf32> -> vector<14x42xf32>
    %75 = arith.addf %70, %74 : vector<14x42xf32>
    %76 = vector.extract_strided_slice %66 {offsets = [2, 0], sizes = [14, 32], strides = [1, 1]} : vector<16x32xf32> to vector<14x32xf32>
    %c2 = arith.constant 2 : index
    %c0_27 = arith.constant 0 : index
    %c0_28 = arith.constant 0 : index
    %77 = vector.load %arg6[%c2, %c0_27, %c0_28] : memref<3x32x42xf32, #tpu.memory_space<vmem>>, vector<1x32x42xf32>
    %78 = vector.shape_cast %77 : vector<1x32x42xf32> to vector<32x42xf32>
    %cst_29 = arith.constant dense<0.000000e+00> : vector<14x42xf32>
    %79 = tpu.matmul %76, %78, %cst_29 {dimension_numbers = #tpu.dot_dimension_numbers<[1], [0], [0], [1], [0, 0, 1, 1], [], []>} : vector<14x32xf32>, vector<32x42xf32>, vector<14x42xf32> -> vector<14x42xf32>
    %80 = arith.addf %75, %79 : vector<14x42xf32>
    %c0_30 = arith.constant 0 : index
    %c0_31 = arith.constant 0 : index
    %81 = vector.load %arg7[%c0_30, %c0_31] : memref<1x42xf32, #tpu.memory_space<vmem>>, vector<1x42xf32>
    %82 = vector.broadcast %81 : vector<1x42xf32> to vector<14x42xf32>
    %83 = arith.addf %80, %82 : vector<14x42xf32>
    %84 = vector.extract_strided_slice %83 {offsets = [0, 0], sizes = [12, 42], strides = [1, 1]} : vector<14x42xf32> to vector<12x42xf32>
    %c0_32 = arith.constant 0 : index
    %c0_33 = arith.constant 0 : index
    %c0_34 = arith.constant 0 : index
    %85 = vector.load %arg8[%c0_32, %c0_33, %c0_34] : memref<3x42x48xf32, #tpu.memory_space<vmem>>, vector<1x42x48xf32>
    %86 = vector.shape_cast %85 : vector<1x42x48xf32> to vector<42x48xf32>
    %cst_35 = arith.constant dense<0.000000e+00> : vector<12x48xf32>
    %87 = tpu.matmul %84, %86, %cst_35 {dimension_numbers = #tpu.dot_dimension_numbers<[1], [0], [0], [1], [0, 0, 1, 1], [], []>} : vector<12x42xf32>, vector<42x48xf32>, vector<12x48xf32> -> vector<12x48xf32>
    %88 = vector.extract_strided_slice %83 {offsets = [1, 0], sizes = [12, 42], strides = [1, 1]} : vector<14x42xf32> to vector<12x42xf32>
    %c1_36 = arith.constant 1 : index
    %c0_37 = arith.constant 0 : index
    %c0_38 = arith.constant 0 : index
    %89 = vector.load %arg8[%c1_36, %c0_37, %c0_38] : memref<3x42x48xf32, #tpu.memory_space<vmem>>, vector<1x42x48xf32>
    %90 = vector.shape_cast %89 : vector<1x42x48xf32> to vector<42x48xf32>
    %cst_39 = arith.constant dense<0.000000e+00> : vector<12x48xf32>
    %91 = tpu.matmul %88, %90, %cst_39 {dimension_numbers = #tpu.dot_dimension_numbers<[1], [0], [0], [1], [0, 0, 1, 1], [], []>} : vector<12x42xf32>, vector<42x48xf32>, vector<12x48xf32> -> vector<12x48xf32>
    %92 = arith.addf %87, %91 : vector<12x48xf32>
    %93 = vector.extract_strided_slice %83 {offsets = [2, 0], sizes = [12, 42], strides = [1, 1]} : vector<14x42xf32> to vector<12x42xf32>
    %c2_40 = arith.constant 2 : index
    %c0_41 = arith.constant 0 : index
    %c0_42 = arith.constant 0 : index
    %94 = vector.load %arg8[%c2_40, %c0_41, %c0_42] : memref<3x42x48xf32, #tpu.memory_space<vmem>>, vector<1x42x48xf32>
    %95 = vector.shape_cast %94 : vector<1x42x48xf32> to vector<42x48xf32>
    %cst_43 = arith.constant dense<0.000000e+00> : vector<12x48xf32>
    %96 = tpu.matmul %93, %95, %cst_43 {dimension_numbers = #tpu.dot_dimension_numbers<[1], [0], [0], [1], [0, 0, 1, 1], [], []>} : vector<12x42xf32>, vector<42x48xf32>, vector<12x48xf32> -> vector<12x48xf32>
    %97 = arith.addf %92, %96 : vector<12x48xf32>
    %c0_44 = arith.constant 0 : index
    %c0_45 = arith.constant 0 : index
    %98 = vector.load %arg9[%c0_44, %c0_45] : memref<1x48xf32, #tpu.memory_space<vmem>>, vector<1x48xf32>
    %99 = vector.broadcast %98 : vector<1x48xf32> to vector<12x48xf32>
    %100 = arith.addf %97, %99 : vector<12x48xf32>
    %c0_46 = arith.constant 0 : index
    %c0_47 = arith.constant 0 : index
    %101 = vector.load %arg10[%c0_46, %c0_47] : memref<12x48xf32, #tpu.memory_space<vmem>>, vector<12x48xf32>
    tpu.vector_store %arg10[%c0_46, %c0_47], %100 {strides = array<i32>} : memref<12x48xf32, #tpu.memory_space<vmem>>, vector<12x48xf32>,
    return
  }
}

</mosaic_0001>

<bundles_post_ra>
// kernel: tpu_custom_call.1
= control target key start
LH: loop header
LB: loop body
LE: loop exit
PB: predicated region body
PF: predicated region fallthrough
CT: control target
= control target key end

     0   :  { %15 = vsyncpa [#allocation3], 0  ;;  %s2630_s0 = inlined_call_operand.vmem [shape: f32[32,8], index: 0, kind: input, shape index: {}]   ;;  %s2631_s1 = inlined_call_operand.vmem [shape: f32[16,16], index: 1, kind: input, shape index: {}]   ;;  %s2632_s2 = inlined_call_operand.vmem [shape: f32[8,16], index: 2, kind: input, shape index: {}]   ;;  %s2633_s3 = inlined_call_operand.vmem [shape: f32[4,16], index: 3, kind: input, shape index: {}]   ;;  %s2634_s4 = inlined_call_operand.vmem [shape: f32[4,16], index: 4, kind: input, shape index: {}]   ;;  %s2635_s5 = inlined_call_operand.vmem [shape: f32[128,32], index: 5, kind: input, shape index: {}]   ;;  %s2636_s6 = inlined_call_operand.hbm [shape: f32[3,32,42], index: 6, kind: input, shape index: {}]   ;;  %s2637_s7 = inlined_call_operand.vmem [shape: f32[1,42], index: 7, kind: input, shape index: {}]   ;;  %s2638_s8 = inlined_call_operand.vmem [shape: f32[3,42,48], index: 8, kind: input, shape index: {}]   ;;  %s2639_s9 = inlined_call_operand.vmem [shape: f32[1,48], index: 9, kind: input, shape index: {}]   ;;  %s2640_s10 = inlined_call_operand.hbm [shape: f32[12,48], index: 10, kind: output, shape index: {}]  }
   0x1   :  { %16 = vsyncpa [#allocation4], 0  ;;  %s2093_s13 = smov [#allocation2]   ;;  %s2045_s17 = scalar_lea.hbm %s2636_s6, 1536 }
   0x2   :  { %s34_s14 = sshll.u32 %s2093_s13, 4  ;;  %p2046_p0 = scmp.ne.s32.totalorder %s2636_s6, %s2045_s17  ;;  %s35_s14 = int_to_ptr.vmem [resolvable:$true] %s34_s14 }
   0x3   :  { %p2049_p1 = scmp.lt.u32.totalorder %s2045_s17, %s2636_s6 }
   0x5   :  { %p2051_p2 = pnand %p2049_p1, %p2046_p0 }
   0x7   :  { %2054 = shalt.err (!%p2051_p2)
}
   0x8   :  { %s2055_s22 = scalar_lea.vmem %s35_s14, 1536  ;;  %p2060_p4 = scmp.lt.s32.totalorder %s35_s14, %s35_s14 }
   0x9   :  { %p2056_p3 = scmp.ne.s32.totalorder %s35_s14, %s2055_s22  ;;  %p2061_p5 = scmp.lt.s32.totalorder %s2055_s22, %s2055_s22 }
   0xb   :  { %p2062_p6 = por %p2061_p5, %p2060_p4 }
   0xd   :  { %p2063_p7 = pnand %p2062_p6, %p2056_p3 }
   0xf   :  { %2066 = shalt.err (!%p2063_p7)
}
  0x10   :  { %s2094_s23 = smov 128   ;;  %s2095_s24 = smov 8  }
  0x11   :  { %40 = dma.hbm_to_vmem [thread:$0]  %s2636_s6, 1536, %s35_s14, [#allocation3], %s2094_s23, %s2094_s23, %s2095_s24  }
  0x12   :  { %2089 = dma.done.wait [#allocation3], 1536  }
  0x13   :  { %2090 = vsyncadd [#allocation3], 4294965760  ;;  %vm55_vm0 = vcmask 64512   ;;  %v54_v0 = vld [vmem:[%s2632_s2] sm:$0xff]  ;;  %v51_v2 = vld [vmem:[%s2630_s0 + $0x8] sm:$0xff]  ;;  %v2096_v5 = vmov 0.0|0.0   ;;  %v327_v21 = vlaneseq }
  0x14   :  { %v50_v1 = vld [vmem:[%s2630_s0] sm:$0xff]  ;;  %1665 = vmatprep.subr.mxu0 %v54_v0  ;;  %v52_v3 = vld [vmem:[%s2630_s0 + $0x10] sm:$0xff]  ;;  %v53_v4 = vld [vmem:[%s2630_s0 + $0x18] sm:$0xff]  ;;  %1808 = vmatprep.subr.bf16.mxu1 %v2096_v5  ;;  %vm2097_vm1 = vmmov 0   ;;  %v2098_v6 = vmov 0.0   ;;  %vm154_vm2 = vcmask 130048  }
  0x15   :  { %1667 = vmatprep.mubr.msk.f32.mxu0 %vm55_vm0, %v50_v1  ;;  %1666 = vmatpush3.msra.mxu0 %v54_v0  ;;  %vm1810_vm3 = vmpackc.low %vm154_vm2, %vm154_vm2  ;;  %v153_v13 = vld [vmem:[%s2633_s3] sm:$0xf]  ;;  %s2099_s18 = smov 112   ;;  %v328_v22 = vshrl.u32 %v327_v21, 7  ;;  %vm319_vm4 = vcmask 1043456   ;;  %s2102_s16 = smov 32  }
  0x16   :  { %1668 = vmatmul.mubr.msk.f32.vlgmr.msra.gmra.mrb[0].mxu0 %vm55_vm0, %v51_v2  ;;  %1681 = vmatprep.mubr.msk.f32.mxu1 %vm2097_vm1, %v2098_v6  ;;  %v240_v14 = vld [vmem:[%s2634_s4] sm:$0xf]  ;;  %v2100_v32 = vmov 1966171168   ;;  %s2103_s17 = smov 48   ;;  %s2104_s15 = smov 64  }
  0x17   :  { %1670 = vmatprep.mubr.msk.f32.mxu0 %vm55_vm0, %v52_v3  ;;  %v340_v23 = vsub.s32 1, %v328_v22  ;;  %v351_v24 = vsub.s32 2, %v328_v22  ;;  %v362_v29 = vsub.s32 3, %v328_v22  ;;  %v373_v31 = vsub.s32 4, %v328_v22  ;;  %s2106_s6 = smov 96  }
  0x18   :  { %v418_v33 = vunpack.c.l.s4 %v2100_v32  ;;  %v384_v35 = vsub.s32 5, %v328_v22  ;;  %v395_v39 = vsub.s32 6, %v328_v22  ;;  %v406_v42 = vsub.s32 7, %v328_v22 }
  0x19   :  { %v329_v50 = vsub.s32 0, %v328_v22 }
  0x1a   :  { %1671 = vmatmul.mubr.msk.f32.gmra.mrb[2].mxu0 %vm55_vm0, %v53_v4  ;;  %v419_v36 = vunpack.c.0.s8 %v418_v33  ;;  %v2235_v4 = vld [vmem:[%s2631_s1] sm:$0xff] }
  0x1b   :  { %vm571_vm5 = vcmp.gt.f32.partialorder %v2235_v4, 0.0 }
  0x1c   :  { %v422_v38 = vsub.s32 %v419_v36, %v328_v22 }
  0xe9   :  { %v2195_v7 = vpop.f32.mrb[0].mxu0 }
  0xea   :  { %v2197_v8 = vpop.f32.mrb[1].mxu0 }
  0xeb   :  { %v1809_v9 = vpack.c.bf16 %v2195_v7, %v2197_v8 }
  0xed   :  { %1811 = vmatpush3.bf16.xpose.msk.msra.mxu1 %vm1810_vm3, %v1809_v9  ;;  %v2203_v10 = vpop.f32.mrb[2].mxu0 }
  0xee   :  { %v2205_v11 = vpop.f32.mrb[3].mxu0  ;;  %1812 = vmatprep.subr.bf16.mxu1 %v2096_v5 }
  0xef   :  { %v1813_v12 = vpack.c.bf16 %v2203_v10, %v2205_v11 }
  0xf5   :  { %1815 = vmatpush3.bf16.xpose.msk.msra.mxu1 %vm1810_vm3, %v1813_v12 }
  0xf6   :  { %1816 = vmatprep.subr.bf16.mxu1 %v2096_v5 }
  0xfc   :  { %1682 = vmatmul.mubr.msk.f32.vlgmr.msra.gmra.mrb[0].mxu1 %vm154_vm2, %v153_v13  ;;  %v2241_v13 = vld [vmem:[%s2631_s1 + $0x8] sm:$0xff]  ;;  %s2101_s1 = smov 16  }
  0xfd   :  { %1819 = vmatpush3.bf16.xpose.msk.msra.mxu1 %vm1810_vm3, %v1809_v9  ;;  %1692 = vmatprep.mubr.msk.f32.mxu1 %vm2097_vm1, %v2098_v6  ;;  %vm572_vm8 = vcmp.gt.f32.partialorder %v2241_v13, 0.0 }
  0xfe   :  { %1820 = vmatprep.subr.bf16.mxu1 %v2096_v5 }
 0x105   :  { %1823 = vmatpush3.bf16.xpose.msk.msra.mxu1 %vm1810_vm3, %v1813_v12 }
 0x10c   :  { %1693 = vmatmul.mubr.msk.f32.vlgmr.msra.gmra.mrb[2].mxu1 %vm154_vm2, %v240_v14 }
 0x1cf   :  { %v236_v15 = vpop.f32.mrb[0].mxu1 }
 0x1d0   :  { %v1683_v16 = vpop.f32.mrb[1].mxu1  ;;  %v315_v17 = vrot.slane %v236_v15, 4 }
 0x1d2   :  { %316 = vrot.lane.b32.xlu0 %v315_v17, %s2099_s18 }
 0x1df   :  { %v310_v18 = vpop.f32.mrb[2].mxu1 }
 0x1e0   :  { %v322_v19 = vrot.slane %v310_v18, 4  ;;  %v1694_v20 = vpop.f32.mrb[3].mxu1 }
 0x1e2   :  { %323 = vrot.lane.b32.xlu0 %v322_v19, %s2099_s18 }
 0x244   :  { %v317_v25 = vpop.permute.xlu0 %316 }
 0x245   :  { %v320_v26 = vsel %vm319_vm4, %v236_v15, %v317_v25 }
 0x246   :  { %v341_v27 = vrot.slane %v320_v26, %v340_v23  ;;  %v352_v28 = vrot.slane %v320_v26, %v351_v24  ;;  %v363_v30 = vrot.slane %v320_v26, %v362_v29  ;;  %v374_v34 = vrot.slane %v320_v26, %v373_v31 }
 0x247   :  { %v385_v37 = vrot.slane %v320_v26, %v384_v35  ;;  %v396_v45 = vrot.slane %v320_v26, %v395_v39  ;;  %v407_v49 = vrot.slane %v320_v26, %v406_v42  ;;  %v330_v62 = vrot.slane %v320_v26, %v329_v50 }
 0x248   :  { %343 = vbcast.lane.b32.xlu1 %v341_v27, 256  ;;  %354 = vbcast.lane.b32.xlu0 %v352_v28, 256 }
 0x24c   :  { %347 = vbcast.lane.b32.xlu1 %v341_v27, 264  ;;  %365 = vbcast.lane.b32.xlu0 %v363_v30, 256 }
 0x250   :  { %358 = vbcast.lane.b32.xlu1 %v352_v28, 264  ;;  %376 = vbcast.lane.b32.xlu0 %v374_v34, 256 }
 0x254   :  { %369 = vbcast.lane.b32.xlu1 %v363_v30, 264  ;;  %387 = vbcast.lane.b32.xlu0 %v385_v37, 256  ;;  %v324_v40 = vpop.permute.xlu0 %323 }
 0x255   :  { %v326_v41 = vsel %vm319_vm4, %v310_v18, %v324_v40 }
 0x256   :  { %v416_v43 = vcombine.high %v326_v41, %v326_v41  ;;  %v423_v44 = vrot.slane %v326_v41, %v422_v38 }
 0x258   :  { %v430_v46 = vrot.slane %v416_v43, %v422_v38  ;;  %v431_v47 = vcombine.high %v423_v44, %v423_v44  ;;  %v439_v48 = vrot.slane %v423_v44, %v422_v38  ;;  %380 = vbcast.lane.b32.xlu1 %v374_v34, 264  ;;  %398 = vbcast.lane.b32.xlu0 %v396_v45, 256 }
 0x25a   :  { %v453_v51 = vrot.slane %v431_v47, %v422_v38  ;;  %v461_v52 = vcombine.high %v439_v48, %v439_v48  ;;  %v446_v53 = vrot.slane %v430_v46, %v422_v38  ;;  %v432_v54 = vcombine.high %v430_v46, %v430_v46 }
 0x25b   :  { %v2222_v55 = vrot.slane %v439_v48, %v329_v50 }
 0x25c   :  { %391 = vbcast.lane.b32.xlu1 %v385_v37, 264  ;;  %409 = vbcast.lane.b32.xlu0 %v407_v49, 256  ;;  %v472_v56 = vrot.slane %v453_v51, %v329_v50  ;;  %v476_v57 = vrot.slane %v461_v52, %v329_v50  ;;  %v463_v58 = vcombine.high %v453_v51, %v453_v51 }
 0x25d   :  { %v2224_v59 = vrot.slane %v446_v53, %v329_v50  ;;  %v460_v60 = vrot.slane %v432_v54, %v422_v38  ;;  %v462_v61 = vcombine.high %v446_v53, %v446_v53 }
 0x25e   :  { %v480_v63 = vrot.slane %v463_v58, %v329_v50 }
 0x25f   :  { %v2226_v0 = vrot.slane %v460_v60, %v329_v50  ;;  %v2228_v1 = vrot.slane %v462_v61, %v329_v50  ;;  %v464_v2 = vcombine.high %v460_v60, %v460_v60 }
 0x260   :  { %402 = vbcast.lane.b32.xlu1 %v396_v45, 264  ;;  %332 = vbcast.lane.b32.xlu0 %v330_v62, 256 }
 0x261   :  { %v2230_v3 = vrot.slane %v464_v2, %v329_v50 }
 0x264   :  { %413 = vbcast.lane.b32.xlu1 %v407_v49, 264 }
 0x268   :  { %336 = vbcast.lane.b32.xlu1 %v330_v62, 264 }
 0x2ba   :  { %v344_v5 = vpop.permute.xlu1 %343  ;;  %v355_v6 = vpop.permute.xlu0 %354 }
 0x2bb   :  { %v507_v9 = vadd.f32 %v472_v56, %v344_v5  ;;  %v509_v12 = vadd.f32 %v476_v57, %v355_v6 }
 0x2bd   :  { %v539_v14 = vmul.f32 0.2, %v507_v9  ;;  %v541_v15 = vmul.f32 0.2, %v509_v12  ;;  %vm523_vm6 = vcmp.gt.f32.partialorder %v507_v9, 0.0  ;;  %vm525_vm7 = vcmp.gt.f32.partialorder %v509_v12, 0.0 }
 0x2be   :  { %v348_v16 = vpop.permute.xlu1 %347  ;;  %v366_v17 = vpop.permute.xlu0 %365 }
 0x2bf   :  { %v508_v18 = vadd.f32 %v472_v56, %v348_v16  ;;  %v511_v19 = vadd.f32 %v480_v63, %v366_v17  ;;  %v555_v20 = vsel %vm523_vm6, %v507_v9, %v539_v14  ;;  %v557_v21 = vsel %vm525_vm7, %v509_v12, %v541_v15 }
 0x2c0   :  { %v2245_v22 = vsel %vm571_vm5, %v555_v20, -9e+15  ;;  %v2250_v23 = vsel %vm571_vm5, %v557_v21, -9e+15 }
 0x2c1   :  { %v540_v24 = vmul.f32 0.2, %v508_v18  ;;  %v543_v25 = vmul.f32 0.2, %v511_v19  ;;  %v599_v26 = vsel %vm154_vm2, %v2245_v22, -inf  ;;  %vm524_vm9 = vcmp.gt.f32.partialorder %v508_v18, 0.0 }
 0x2c2   :  { %v359_v27 = vpop.permute.xlu1 %358  ;;  %600 = vmax.xlane.f32.xlu0 %v599_v26  ;;  %v377_v28 = vpop.permute.xlu0 %376  ;;  %vm527_vm10 = vcmp.gt.f32.partialorder %v511_v19, 0.0  ;;  %v605_v34 = vsel %vm154_vm2, %v2250_v23, -inf }
 0x2c3   :  { %v510_v29 = vadd.f32 %v476_v57, %v359_v27  ;;  %v513_v30 = vadd.f32 %v2224_v59, %v377_v28  ;;  %v556_v31 = vsel %vm524_vm9, %v508_v18, %v540_v24  ;;  %v559_v32 = vsel %vm527_vm10, %v511_v19, %v543_v25 }
 0x2c4   :  { %v2257_v33 = vsel %vm572_vm8, %v556_v31, -9e+15  ;;  %v2263_v35 = vsel %vm571_vm5, %v559_v32, -9e+15  ;;  %vm830_vm9 = vcmask 392192   ;;  %vm833_vm10 = vcmask 523264  }
 0x2c5   :  { %v542_v36 = vmul.f32 0.2, %v510_v29  ;;  %v545_v37 = vmul.f32 0.2, %v513_v30  ;;  %v602_v38 = vsel %vm154_vm2, %v2257_v33, -inf  ;;  %vm526_vm11 = vcmp.gt.f32.partialorder %v510_v29, 0.0 }
 0x2c6   :  { %v370_v39 = vpop.permute.xlu1 %369  ;;  %603 = vmax.xlane.f32.xlu1 %v602_v38  ;;  %606 = vmax.xlane.f32.xlu0 %v605_v34  ;;  %v388_v40 = vpop.permute.xlu0 %387  ;;  %vm529_vm12 = vcmp.gt.f32.partialorder %v513_v30, 0.0  ;;  %v611_v46 = vsel %vm154_vm2, %v2263_v35, -inf }
 0x2c7   :  { %v512_v41 = vadd.f32 %v480_v63, %v370_v39  ;;  %v515_v42 = vadd.f32 %v2226_v0, %v388_v40  ;;  %v558_v43 = vsel %vm526_vm11, %v510_v29, %v542_v36  ;;  %v561_v44 = vsel %vm529_vm12, %v513_v30, %v545_v37 }
 0x2c8   :  { %v2270_v45 = vsel %vm572_vm8, %v558_v43, -9e+15  ;;  %v2276_v47 = vsel %vm571_vm5, %v561_v44, -9e+15  ;;  %vm836_vm11 = vcmask 654336   ;;  %vm839_vm12 = vcmask 785408  }
 0x2c9   :  { %v544_v48 = vmul.f32 0.2, %v512_v41  ;;  %v547_v49 = vmul.f32 0.2, %v515_v42  ;;  %v608_v50 = vsel %vm154_vm2, %v2270_v45, -inf  ;;  %vm528_vm13 = vcmp.gt.f32.partialorder %v512_v41, 0.0 }
 0x2ca   :  { %v381_v51 = vpop.permute.xlu1 %380  ;;  %609 = vmax.xlane.f32.xlu0 %v608_v50  ;;  %612 = vmax.xlane.f32.xlu1 %v611_v46  ;;  %v399_v52 = vpop.permute.xlu0 %398  ;;  %vm531_vm14 = vcmp.gt.f32.partialorder %v515_v42, 0.0  ;;  %v617_v60 = vsel %vm154_vm2, %v2276_v47, -inf }
 0x2cb   :  { %v514_v53 = vadd.f32 %v2224_v59, %v381_v51  ;;  %v517_v54 = vadd.f32 %v2228_v1, %v399_v52  ;;  %v560_v56 = vsel %vm528_vm13, %v512_v41, %v544_v48  ;;  %v563_v57 = vsel %vm531_vm14, %v515_v42, %v547_v49 }
 0x2cc   :  { %v2284_v58 = vsel %vm572_vm8, %v560_v56, -9e+15  ;;  %v2290_v61 = vsel %vm571_vm5, %v563_v57, -9e+15  ;;  %vm842_vm13 = vcmask 916480   ;;  %vm1146_vm14 = vcmask 1045504  }
 0x2cd   :  { %v546_v62 = vmul.f32 0.2, %v514_v53  ;;  %v549_v63 = vmul.f32 0.2, %v517_v54  ;;  %v614_v59 = vsel %vm154_vm2, %v2284_v58, -inf  ;;  %vm530_vm15 = vcmp.gt.f32.partialorder %v514_v53, 0.0 }
 0x2ce   :  { %v392_v2 = vpop.permute.xlu1 %391  ;;  %615 = vmax.xlane.f32.xlu0 %v614_v59  ;;  %618 = vmax.xlane.f32.xlu1 %v617_v60  ;;  %v410_v5 = vpop.permute.xlu0 %409  ;;  %vm533_vm0 = vcmp.gt.f32.partialorder %v517_v54, 0.0  ;;  %v623_v16 = vsel %vm154_vm2, %v2290_v61, -inf }
 0x2cf   :  { %v516_v6 = vadd.f32 %v2226_v0, %v392_v2  ;;  %v519_v9 = vadd.f32 %v2230_v3, %v410_v5  ;;  %v562_v12 = vsel %vm530_vm15, %v514_v53, %v546_v62  ;;  %v565_v14 = vsel %vm533_vm0, %v517_v54, %v549_v63 }
 0x2d0   :  { %v2298_v15 = vsel %vm572_vm8, %v562_v12, -9e+15  ;;  %v2304_v17 = vsel %vm571_vm5, %v565_v14, -9e+15  ;;  %vm1263_vm15 = vcmask 1041408   ;;  %vm2107_vm0 = vmmov 1  }
 0x2d1   :  { %v548_v18 = vmul.f32 0.2, %v516_v6  ;;  %v551_v19 = vmul.f32 0.2, %v519_v9  ;;  %v620_v0 = vsel %vm154_vm2, %v2298_v15, -inf  ;;  %vm532_vm1 = vcmp.gt.f32.partialorder %v516_v6, 0.0 }
 0x2d2   :  { %v403_v20 = vpop.permute.xlu1 %402  ;;  %621 = vmax.xlane.f32.xlu0 %v620_v0  ;;  %624 = vmax.xlane.f32.xlu1 %v623_v16  ;;  %v333_v21 = vpop.permute.xlu0 %332  ;;  %vm535_vm3 = vcmp.gt.f32.partialorder %v519_v9, 0.0  ;;  %v629_v29 = vsel %vm154_vm2, %v2304_v17, -inf }
 0x2d3   :  { %v518_v24 = vadd.f32 %v2228_v1, %v403_v20  ;;  %v505_v25 = vadd.f32 %v2222_v55, %v333_v21  ;;  %v564_v26 = vsel %vm532_vm1, %v516_v6, %v548_v18  ;;  %v567_v27 = vsel %vm535_vm3, %v519_v9, %v551_v19  ;;  %vm2548_vm1 = vmpackc.low %vm1263_vm15, %vm2107_vm0 }
 0x2d4   :  { %v2312_v28 = vsel %vm572_vm8, %v564_v26, -9e+15  ;;  %v2320_v1 = vsel %vm571_vm5, %v567_v27, -9e+15  ;;  %vm1258_vm3 = vcmask 343040  }
 0x2d5   :  { %v550_v30 = vmul.f32 0.2, %v518_v24  ;;  %v537_v31 = vmul.f32 0.2, %v505_v25  ;;  %v626_v32 = vsel %vm154_vm2, %v2312_v28, -inf  ;;  %vm534_vm4 = vcmp.gt.f32.partialorder %v518_v24, 0.0 }
 0x2d6   :  { %v414_v34 = vpop.permute.xlu1 %413  ;;  %627 = vmax.xlane.f32.xlu0 %v626_v32  ;;  %630 = vmax.xlane.f32.xlu1 %v629_v29  ;;  %vm521_vm6 = vcmp.gt.f32.partialorder %v505_v25, 0.0  ;;  %v635_v43 = vsel %vm154_vm2, %v2320_v1, -inf }
 0x2d7   :  { %v520_v36 = vadd.f32 %v2230_v3, %v414_v34  ;;  %v566_v37 = vsel %vm534_vm4, %v518_v24, %v550_v30  ;;  %v553_v38 = vsel %vm521_vm6, %v505_v25, %v537_v31  ;;  %vm1528_vm4 = vcmask 388096  }
 0x2d8   :  { %v2325_v39 = vsel %vm572_vm8, %v566_v37, -9e+15  ;;  %v2329_v40 = vsel %vm571_vm5, %v553_v38, -9e+15 }
 0x2d9   :  { %v552_v41 = vmul.f32 0.2, %v520_v36  ;;  %v632_v42 = vsel %vm154_vm2, %v2325_v39, -inf  ;;  %vm536_vm7 = vcmp.gt.f32.partialorder %v520_v36, 0.0 }
 0x2da   :  { %v337_v44 = vpop.permute.xlu1 %336  ;;  %633 = vmax.xlane.f32.xlu0 %v632_v42  ;;  %636 = vmax.xlane.f32.xlu1 %v635_v43 }
 0x2db   :  { %v506_v3 = vadd.f32 %v2222_v55, %v337_v44  ;;  %v568_v46 = vsel %vm536_vm7, %v520_v36, %v552_v41  ;;  %v593_v55 = vsel %vm154_vm2, %v2329_v40, -inf }
 0x2dc   :  { %v2338_v48 = vsel %vm572_vm8, %v568_v46, -9e+15 }
 0x2dd   :  { %v538_v4 = vmul.f32 0.2, %v506_v3  ;;  %v638_v49 = vsel %vm154_vm2, %v2338_v48, -inf  ;;  %vm522_vm5 = vcmp.gt.f32.partialorder %v506_v3, 0.0 }
 0x2de   :  { %639 = vmax.xlane.f32.xlu0 %v638_v49 }
 0x2df   :  { %v554_v50 = vsel %vm522_vm5, %v506_v3, %v538_v4 }
 0x2e0   :  { %v2344_v51 = vsel %vm572_vm8, %v554_v50, -9e+15  ;;  %vm827_vm8 = vcmask 261120  }
 0x2e1   :  { %v596_v52 = vsel %vm154_vm2, %v2344_v51, -inf }
 0x2eb   :  { %845 = vrot.lane.b32.xlu1 %v2197_v8, %s2101_s1 }
 0x2f4   :  { %847 = vrot.lane.b32.xlu0 %v2195_v7, %s2101_s1 }
 0x30f   :  { %594 = vmax.xlane.f32.xlu1 %v593_v55 }
 0x313   :  { %597 = vmax.xlane.f32.xlu0 %v596_v52 }
 0x34f   :  { %v601_v53 = vpop.xlane.xlu0 %600 }
 0x350   :  { %v643_v13 = vsub.f32 %v2245_v22, %v601_v53 }
 0x352   :  { %v661_v54 = vmul.f32 1.442695, %v643_v13 }
 0x353   :  { %v604_v56 = vpop.xlane.xlu1 %603  ;;  %v607_v57 = vpop.xlane.xlu0 %606 }
 0x354   :  { %1981 = vpow2.f32 %v661_v54  ;;  %v644_v60 = vsub.f32 %v2257_v33, %v604_v56  ;;  %v645_v62 = vsub.f32 %v2250_v23, %v607_v57  ;;  %v865_v54 = vld [vmem:[%s2635_s5 + $0x20] sm:$0xff]  ;;  %v862_v56 = vld [vmem:[%s2635_s5 + $0x8] sm:$0xff] }
 0x356   :  { %v663_v63 = vmul.f32 1.442695, %v644_v60  ;;  %v665_v59 = vmul.f32 1.442695, %v645_v62  ;;  %v868_v62 = vld [vmem:[%s2635_s5 + $0x38] sm:$0xff] }
 0x357   :  { %v613_v2 = vpop.xlane.xlu1 %612  ;;  %v610_v5 = vpop.xlane.xlu0 %609 }
 0x358   :  { %1983 = vpow2.f32 %v663_v63  ;;  %v647_v6 = vsub.f32 %v2263_v35, %v613_v2  ;;  %v646_v9 = vsub.f32 %v2270_v45, %v610_v5 }
 0x359   :  { %1985 = vpow2.f32 %v665_v59  ;;  %v867_v59 = vld [vmem:[%s2635_s5 + $0x30] sm:$0xff] }
 0x35a   :  { %v669_v12 = vmul.f32 1.442695, %v647_v6  ;;  %v667_v22 = vmul.f32 1.442695, %v646_v9 }
 0x35b   :  { %v619_v14 = vpop.xlane.xlu1 %618  ;;  %v616_v16 = vpop.xlane.xlu0 %615 }
 0x35c   :  { %1987 = vpow2.f32 %v669_v12  ;;  %v649_v18 = vsub.f32 %v2276_v47, %v619_v14  ;;  %v648_v33 = vsub.f32 %v2284_v58, %v616_v16 }
 0x35d   :  { %1989 = vpow2.f32 %v667_v22 }
 0x35e   :  { %v2361_v23 = vpop.eup %1981  ;;  %v673_v19 = vmul.f32 1.442695, %v649_v18  ;;  %v671_v0 = vmul.f32 1.442695, %v648_v33 }
 0x35f   :  { %v625_v20 = vpop.xlane.xlu1 %624  ;;  %v622_v21 = vpop.xlane.xlu0 %621  ;;  %v695_v35 = vsel %vm154_vm2, %v2361_v23, 0.0 }
 0x360   :  { %1991 = vpow2.f32 %v673_v19  ;;  %v651_v45 = vsub.f32 %v2290_v61, %v625_v20  ;;  %v650_v24 = vsub.f32 %v2298_v15, %v622_v21  ;;  %696 = vadd.xlane.f32.xlu1 %v695_v35 }
 0x361   :  { %1993 = vpow2.f32 %v671_v0 }
 0x362   :  { %v2367_v47 = vpop.eup %1983  ;;  %v677_v58 = vmul.f32 1.442695, %v651_v45  ;;  %v675_v25 = vmul.f32 1.442695, %v650_v24 }
 0x363   :  { %v2369_v26 = vpop.eup %1985  ;;  %v631_v27 = vpop.xlane.xlu1 %630  ;;  %v698_v30 = vsel %vm154_vm2, %v2367_v47, 0.0 }
 0x364   :  { %v628_v29 = vpop.xlane.xlu0 %627  ;;  %1995 = vpow2.f32 %v677_v58  ;;  %v653_v31 = vsub.f32 %v2304_v17, %v631_v27  ;;  %699 = vadd.xlane.f32.xlu0 %v698_v30  ;;  %v701_v15 = vsel %vm154_vm2, %v2369_v26, 0.0 }
 0x365   :  { %v652_v61 = vsub.f32 %v2312_v28, %v628_v29  ;;  %1997 = vpow2.f32 %v675_v25  ;;  %702 = vadd.xlane.f32.xlu1 %v701_v15 }
 0x366   :  { %v2377_v32 = vpop.eup %1987  ;;  %v681_v34 = vmul.f32 1.442695, %v653_v31 }
 0x367   :  { %v679_v36 = vmul.f32 1.442695, %v652_v61  ;;  %v2379_v37 = vpop.eup %1989  ;;  %v637_v38 = vpop.xlane.xlu1 %636  ;;  %v707_v42 = vsel %vm154_vm2, %v2377_v32, 0.0 }
 0x368   :  { %v634_v41 = vpop.xlane.xlu0 %633  ;;  %1999 = vpow2.f32 %v681_v34  ;;  %v655_v17 = vsub.f32 %v2320_v1, %v637_v38  ;;  %v704_v43 = vsel %vm154_vm2, %v2379_v37, 0.0  ;;  %v861_v1 = vld [vmem:[%s2635_s5] sm:$0xff] }
 0x369   :  { %v654_v28 = vsub.f32 %v2325_v39, %v634_v41  ;;  %2001 = vpow2.f32 %v679_v36  ;;  %708 = vadd.xlane.f32.xlu1 %v707_v42  ;;  %705 = vadd.xlane.f32.xlu0 %v704_v43  ;;  %v863_v39 = vld [vmem:[%s2635_s5 + $0x10] sm:$0xff] }
 0x36a   :  { %v2387_v44 = vpop.eup %1991  ;;  %v685_v3 = vmul.f32 1.442695, %v655_v17 }
 0x36b   :  { %v683_v46 = vmul.f32 1.442695, %v654_v28  ;;  %v2389_v4 = vpop.eup %1993  ;;  %v846_v49 = vpop.permute.xlu1 %845  ;;  %v713_v55 = vsel %vm154_vm2, %v2387_v44, 0.0 }
 0x36c   :  { %v640_v50 = vpop.xlane.xlu0 %639  ;;  %2003 = vpow2.f32 %v685_v3  ;;  %v857_v52 = vsel %vm154_vm2, %v2197_v8, %v846_v49  ;;  %v710_v13 = vsel %vm154_vm2, %v2389_v4, 0.0  ;;  %v864_v8 = vld [vmem:[%s2635_s5 + $0x18] sm:$0xff] }
 0x36d   :  { %v656_v53 = vsub.f32 %v2338_v48, %v640_v50  ;;  %2005 = vpow2.f32 %v683_v46  ;;  %714 = vadd.xlane.f32.xlu1 %v713_v55  ;;  %711 = vadd.xlane.f32.xlu0 %v710_v13  ;;  %v866_v48 = vld [vmem:[%s2635_s5 + $0x28] sm:$0xff]  ;;  %v877_v2 = vmul.f32 %v861_v1, %v857_v52  ;;  %v879_v5 = vmul.f32 %v863_v39, %v857_v52 }
 0x36e   :  { %v2410_v57 = vpop.eup %1995  ;;  %v881_v12 = vmul.f32 %v865_v54, %v857_v52  ;;  %v883_v20 = vmul.f32 %v867_v59, %v857_v52 }
 0x36f   :  { %v687_v60 = vmul.f32 1.442695, %v656_v53  ;;  %v2421_v63 = vpop.eup %1997  ;;  %v719_v9 = vsel %vm154_vm2, %v2410_v57, 0.0 }
 0x370   :  { %v848_v6 = vpop.permute.xlu0 %847  ;;  %v716_v14 = vsel %vm154_vm2, %v2421_v63, 0.0 }
 0x371   :  { %2007 = vpow2.f32 %v687_v60  ;;  %v858_v22 = vsel %vm154_vm2, %v2195_v7, %v848_v6  ;;  %720 = vadd.xlane.f32.xlu1 %v719_v9  ;;  %717 = vadd.xlane.f32.xlu0 %v716_v14 }
 0x372   :  { %v878_v16 = vmul.f32 %v862_v56, %v858_v22  ;;  %v880_v18 = vmul.f32 %v864_v8, %v858_v22  ;;  %v882_v33 = vmul.f32 %v866_v48, %v858_v22  ;;  %v884_v19 = vmul.f32 %v868_v62, %v858_v22  ;;  %v2432_v0 = vpop.eup %1999 }
 0x373   :  { %v2434_v21 = vpop.eup %2001  ;;  %v725_v35 = vsel %vm154_vm2, %v2432_v0, 0.0 }
 0x374   :  { %v1824_v45 = vpack.c.bf16 %v878_v16, %v877_v2  ;;  %v1828_v24 = vpack.c.bf16 %v880_v18, %v879_v5  ;;  %v1832_v7 = vpack.c.bf16 %v882_v33, %v881_v12  ;;  %v722_v58 = vsel %vm154_vm2, %v2434_v21, 0.0 }
 0x375   :  { %v1836_v25 = vpack.c.bf16 %v884_v19, %v883_v20  ;;  %726 = vadd.xlane.f32.xlu1 %v725_v35  ;;  %723 = vadd.xlane.f32.xlu0 %v722_v58 }
 0x376   :  { %1825 = vmatprep.subr.bf16.mxu1 %v1824_v45  ;;  %v2440_v27 = vpop.eup %2003 }
 0x377   :  { %1827 = vmatpush3.bf16.msra.mxu1 %v1824_v45  ;;  %v2442_v29 = vpop.eup %2005  ;;  %v731_v30 = vsel %vm154_vm2, %v2440_v27, 0.0 }
 0x378   :  { %1829 = vmatprep.subr.bf16.mxu1 %v1828_v24  ;;  %v728_v31 = vsel %vm154_vm2, %v2442_v29, 0.0 }
 0x379   :  { %732 = vadd.xlane.f32.xlu1 %v731_v30  ;;  %729 = vadd.xlane.f32.xlu0 %v728_v31  ;;  %v874_v30 = vld [vmem:[%s2635_s5 + $0x68] sm:$0xff]  ;;  %v876_v31 = vld [vmem:[%s2635_s5 + $0x78] sm:$0xff] }
 0x37b   :  { %v2448_v61 = vpop.eup %2007  ;;  %1831 = vmatpush3.bf16.msra.mxu1 %v1828_v24  ;;  %v873_v24 = vld [vmem:[%s2635_s5 + $0x60] sm:$0xff] }
 0x37c   :  { %1833 = vmatprep.subr.bf16.mxu1 %v1832_v7  ;;  %v734_v15 = vsel %vm154_vm2, %v2448_v61, 0.0 }
 0x37d   :  { %735 = vadd.xlane.f32.xlu0 %v734_v15  ;;  %v875_v15 = vld [vmem:[%s2635_s5 + $0x70] sm:$0xff] }
 0x37f   :  { %1835 = vmatpush3.bf16.msra.mxu1 %v1832_v7 }
 0x380   :  { %1837 = vmatprep.subr.bf16.mxu1 %v1836_v25 }
 0x383   :  { %1839 = vmatpush3.bf16.msra.mxu1 %v1836_v25  ;;  %v872_v25 = vld [vmem:[%s2635_s5 + $0x58] sm:$0xff] }
 0x38a   :  { %849 = vrot.lane.b32.xlu1 %v2205_v11, %s2101_s1 }
 0x393   :  { %851 = vrot.lane.b32.xlu0 %v2203_v10, %s2101_s1 }
 0x39c   :  { %v595_v34 = vpop.xlane.xlu1 %594 }
 0x39d   :  { %v641_v36 = vsub.f32 %v2329_v40, %v595_v34 }
 0x39f   :  { %v657_v38 = vmul.f32 1.442695, %v641_v36 }
 0x3a0   :  { %v598_v41 = vpop.xlane.xlu0 %597 }
 0x3a1   :  { %2009 = vpow2.f32 %v657_v38  ;;  %v642_v42 = vsub.f32 %v2344_v51, %v598_v41 }
 0x3a3   :  { %v659_v17 = vmul.f32 1.442695, %v642_v42 }
 0x3a5   :  { %2011 = vpow2.f32 %v659_v17 }
 0x3ab   :  { %v2458_v28 = vpop.eup %2009 }
 0x3ac   :  { %v689_v43 = vsel %vm154_vm2, %v2458_v28, 0.0 }
 0x3ae   :  { %690 = vadd.xlane.f32.xlu1 %v689_v43 }
 0x3af   :  { %v2462_v3 = vpop.eup %2011 }
 0x3b0   :  { %v692_v46 = vsel %vm154_vm2, %v2462_v3, 0.0 }
 0x3b2   :  { %693 = vadd.xlane.f32.xlu0 %v692_v46 }
 0x3ed   :  { %v697_v40 = vpop.xlane.xlu1 %696 }
 0x3ee   :  { %2013 = vrcp.f32 %v697_v40 }
 0x3f1   :  { %v700_v49 = vpop.xlane.xlu0 %699 }
 0x3f2   :  { %v703_v50 = vpop.xlane.xlu1 %702  ;;  %2015 = vrcp.f32 %v700_v49 }
 0x3f3   :  { %2017 = vrcp.f32 %v703_v50 }
 0x3f6   :  { %v709_v51 = vpop.xlane.xlu1 %708  ;;  %v706_v55 = vpop.xlane.xlu0 %705 }
 0x3f7   :  { %2019 = vrcp.f32 %v706_v55 }
 0x3f8   :  { %v2014_v1 = vpop.eup %2013  ;;  %2021 = vrcp.f32 %v709_v51 }
 0x3f9   :  { %v755_v13 = vmul.f32 %v2014_v1, %v2361_v23 }
 0x3fa   :  { %v715_v39 = vpop.xlane.xlu1 %714  ;;  %v712_v52 = vpop.xlane.xlu0 %711 }
 0x3fb   :  { %2023 = vrcp.f32 %v712_v52 }
 0x3fc   :  { %v2016_v53 = vpop.eup %2015  ;;  %2025 = vrcp.f32 %v715_v39 }
 0x3fd   :  { %v756_v54 = vmul.f32 %v2016_v53, %v2367_v47  ;;  %v2018_v48 = vpop.eup %2017 }
 0x3fe   :  { %v721_v56 = vpop.xlane.xlu1 %720  ;;  %v718_v60 = vpop.xlane.xlu0 %717  ;;  %v757_v5 = vmul.f32 %v2018_v48, %v2369_v26 }
 0x3ff   :  { %v1946_v8 = vpack.i.bf16 %v756_v54, %v755_v13  ;;  %2027 = vrcp.f32 %v718_v60  ;;  %v973_v13 = vld [vmem:[#allocation2 + $0x20] sm:$0xff]  ;;  %v974_v54 = vld [vmem:[#allocation2 + $0x28] sm:$0xff] }
 0x400   :  { %2029 = vrcp.f32 %v721_v56 }
 0x401   :  { %1947 = vrot.lane.b32.xlu1 %v1946_v8, %s2101_s1  ;;  %v2020_v62 = vpop.eup %2019 }
 0x402   :  { %v727_v59 = vpop.xlane.xlu1 %726  ;;  %v724_v2 = vpop.xlane.xlu0 %723  ;;  %v758_v6 = vmul.f32 %v2020_v62, %v2379_v37 }
 0x403   :  { %v2022_v9 = vpop.eup %2021  ;;  %2031 = vrcp.f32 %v724_v2 }
 0x404   :  { %2033 = vrcp.f32 %v727_v59  ;;  %v1951_v23 = vpack.i.bf16 %v758_v6, %v757_v5  ;;  %v759_v14 = vmul.f32 %v2022_v9, %v2377_v32  ;;  %v869_v32 = vld [vmem:[%s2635_s5 + $0x40] sm:$0xff] }
 0x405   :  { %v2024_v47 = vpop.eup %2023 }
 0x406   :  { %v733_v12 = vpop.xlane.xlu1 %732  ;;  %1952 = vrot.lane.b32.xlu1 %v1951_v23, %s2102_s16  ;;  %v730_v22 = vpop.xlane.xlu0 %729  ;;  %v760_v16 = vmul.f32 %v2024_v47, %v2389_v4  ;;  %v871_v4 = vld [vmem:[%s2635_s5 + $0x50] sm:$0xff] }
 0x407   :  { %v2026_v18 = vpop.eup %2025  ;;  %2035 = vrcp.f32 %v730_v22 }
 0x408   :  { %v1956_v33 = vpack.i.bf16 %v760_v16, %v759_v14  ;;  %2037 = vrcp.f32 %v733_v12  ;;  %v761_v20 = vmul.f32 %v2026_v18, %v2387_v44 }
 0x409   :  { %v2028_v19 = vpop.eup %2027 }
 0x40a   :  { %v850_v26 = vpop.permute.xlu1 %849  ;;  %1957 = vrot.lane.b32.xlu0 %v1956_v33, %s2103_s17  ;;  %v736_v37 = vpop.xlane.xlu0 %735  ;;  %v762_v35 = vmul.f32 %v2028_v19, %v2421_v63  ;;  %v870_v63 = vld [vmem:[%s2635_s5 + $0x48] sm:$0xff]  ;;  %s2105_s5 = smov 80  }
 0x40b   :  { %v2030_v45 = vpop.eup %2029  ;;  %v859_v7 = vsel %vm154_vm2, %v2205_v11, %v850_v26  ;;  %2039 = vrcp.f32 %v736_v37 }
 0x40c   :  { %v1961_v44 = vpack.i.bf16 %v762_v35, %v761_v20  ;;  %v763_v36 = vmul.f32 %v2030_v45, %v2410_v57  ;;  %v885_v41 = vmul.f32 %v869_v32, %v859_v7  ;;  %v887_v42 = vmul.f32 %v871_v4, %v859_v7 }
 0x40d   :  { %v2032_v58 = vpop.eup %2031  ;;  %v889_v17 = vmul.f32 %v873_v24, %v859_v7  ;;  %v891_v55 = vmul.f32 %v875_v15, %v859_v7 }
 0x40e   :  { %v2034_v11 = vpop.eup %2033  ;;  %1962 = vrot.lane.b32.xlu1 %v1961_v44, %s2104_s15  ;;  %v852_v34 = vpop.permute.xlu0 %851  ;;  %v764_v38 = vmul.f32 %v2032_v58, %v2434_v21 }
 0x40f   :  { %v860_v43 = vsel %vm154_vm2, %v2203_v10, %v852_v34  ;;  %v765_v39 = vmul.f32 %v2034_v11, %v2432_v0  ;;  %v1856_v10 = vpack.c.bf16 %v974_v54, %v973_v13 }
 0x410   :  { %v886_v46 = vmul.f32 %v870_v63, %v860_v43  ;;  %v888_v40 = vmul.f32 %v872_v25, %v860_v43  ;;  %v890_v49 = vmul.f32 %v874_v30, %v860_v43  ;;  %v892_v50 = vmul.f32 %v876_v31, %v860_v43  ;;  %v975_v43 = vld [vmem:[#allocation2 + $0x30] sm:$0xff] }
 0x411   :  { %v2036_v51 = vpop.eup %2035  ;;  %v1966_v1 = vpack.i.bf16 %v764_v38, %v763_v36  ;;  %1857 = vmatprep.subr.bf16.mxu0 %v1856_v10 }
 0x412   :  { %v1840_v52 = vpack.c.bf16 %v886_v46, %v885_v41  ;;  %v766_v57 = vmul.f32 %v2036_v51, %v2442_v29  ;;  %v1844_v53 = vpack.c.bf16 %v888_v40, %v887_v42  ;;  %v1848_v21 = vpack.c.bf16 %v890_v49, %v889_v17  ;;  %v2038_v60 = vpop.eup %2037  ;;  %1859 = vmatpush3.bf16.msra.mxu0 %v1856_v10  ;;  %v976_v46 = vld [vmem:[#allocation2 + $0x38] sm:$0xff]  ;;  %v968_v49 = vld [vmem:[#allocation2] sm:$0xff] }
 0x413   :  { %1967 = vrot.lane.b32.xlu0 %v1966_v1, %s2105_s5  ;;  %v1852_v56 = vpack.c.bf16 %v892_v50, %v891_v55  ;;  %v767_v0 = vmul.f32 %v2038_v60, %v2440_v27  ;;  %v1860_v40 = vpack.c.bf16 %v976_v46, %v975_v43  ;;  %v969_v50 = vld [vmem:[#allocation2 + $0x8] sm:$0xff]  ;;  %v1142_v60 = vld [vmem:[#allocation2 + $0x40] sm:$0xff] }
 0x414   :  { %1841 = vmatprep.subr.bf16.mxu1 %v1840_v52  ;;  %v1971_v8 = vpack.i.bf16 %v766_v57, %v765_v39  ;;  %v1864_v51 = vpack.c.bf16 %v969_v50, %v968_v49  ;;  %v970_v57 = vld [vmem:[#allocation2 + $0x10] sm:$0xff] }
 0x415   :  { %1843 = vmatpush3.bf16.msra.mxu1 %v1840_v52  ;;  %v2040_v48 = vpop.eup %2039  ;;  %1861 = vmatprep.subr.bf16.mxu0 %v1860_v40 }
 0x416   :  { %1972 = vrot.lane.b32.xlu1 %v1971_v8, %s2106_s6  ;;  %1845 = vmatprep.subr.bf16.mxu1 %v1844_v53  ;;  %v768_v29 = vmul.f32 %v2040_v48, %v2448_v61  ;;  %v1143_v8 = vld [vmem:[#allocation2 + $0x48] sm:$0xff] }
 0x417   :  { %1863 = vmatpush3.bf16.msra.mxu0 %v1860_v40  ;;  %v1872_v48 = vpack.c.bf16 %v1143_v8, %v1142_v60 }
 0x418   :  { %v1976_v62 = vpack.i.bf16 %v768_v29, %v767_v0  ;;  %1865 = vmatprep.subr.bf16.mxu0 %v1864_v51  ;;  %v1144_v0 = vld [vmem:[#allocation2 + $0x50] sm:$0xff]  ;;  %v1145_v29 = vld [vmem:[#allocation2 + $0x58] sm:$0xff] }
 0x419   :  { %1847 = vmatpush3.bf16.msra.mxu1 %v1844_v53  ;;  %v971_v53 = vld [vmem:[#allocation2 + $0x18] sm:$0xff] }
 0x41a   :  { %1849 = vmatprep.subr.bf16.mxu1 %v1848_v21  ;;  %1977 = vrot.lane.b32.xlu0 %v1976_v62, %s2099_s18  ;;  %v1876_v62 = vpack.c.bf16 %v1145_v29, %v1144_v0 }
 0x41d   :  { %1851 = vmatpush3.bf16.msra.mxu1 %v1848_v21 }
 0x41e   :  { %1853 = vmatprep.subr.bf16.mxu1 %v1852_v56 }
 0x421   :  { %1855 = vmatpush3.bf16.msra.mxu1 %v1852_v56  ;;  %v1868_v56 = vpack.c.bf16 %v971_v53, %v970_v57 }
 0x43b   :  { %v691_v59 = vpop.xlane.xlu1 %690 }
 0x43c   :  { %2041 = vrcp.f32 %v691_v59  ;;  %v1568_v59 = vld [vmem:[%s2638_s8 + $0x30] sm:$0xff] }
 0x43f   :  { %v694_v2 = vpop.xlane.xlu0 %693 }
 0x440   :  { %2043 = vrcp.f32 %v694_v2  ;;  %v1569_v2 = vld [vmem:[%s2638_s8 + $0x38] sm:$0xff] }
 0x446   :  { %v2042_v23 = vpop.eup %2041 }
 0x447   :  { %v753_v18 = vmul.f32 %v2042_v23, %v2458_v28 }
 0x44a   :  { %v2044_v47 = vpop.eup %2043 }
 0x44b   :  { %v754_v33 = vmul.f32 %v2044_v47, %v2462_v3  ;;  %v1573_v47 = vld [vmem:[%s2638_s8 + $0x58] sm:$0x3] }
 0x473   :  { %v1948_v5 = vpop.permute.xlu1 %1947 }
 0x474   :  { %v1950_v61 = vunpack.i.h.bf16 %v1948_v5  ;;  %v1949_v12 = vunpack.i.l.bf16 %v1948_v5  ;;  %v1880_v5 = vpack.c.bf16 %v1569_v2, %v1568_v59 }
 0x476   :  { %v825_v45 = vsel %vm154_vm2, %v753_v18, %v1949_v12  ;;  %v826_v32 = vsel %vm154_vm2, %v754_v33, %v1950_v61  ;;  %vm979_vm2 = vcmask 1046528   ;;  %v1567_v18 = vld [vmem:[%s2637_s7] ss:$0 sm:$0xff] }
 0x478   :  { %v1953_v6 = vpop.permute.xlu1 %1952 }
 0x479   :  { %v1955_v22 = vunpack.i.h.bf16 %v1953_v6  ;;  %v1954_v14 = vunpack.i.l.bf16 %v1953_v6  ;;  %v1570_v6 = vld [vmem:[%s2638_s8 + $0x40] sm:$0xff] }
 0x47b   :  { %v828_v7 = vsel %vm827_vm8, %v825_v45, %v1954_v14  ;;  %v829_v44 = vsel %vm827_vm8, %v826_v32, %v1955_v22  ;;  %v1240_v22 = vld [vmem:[%s2638_s8] sm:$0xff]  ;;  %v1241_v14 = vld [vmem:[%s2638_s8 + $0x8] sm:$0xff]  ;;  %v1242_v45 = vld [vmem:[%s2638_s8 + $0x10] sm:$0xff] }
 0x47c   :  { %v1958_v9 = vpop.permute.xlu0 %1957  ;;  %v1243_v32 = vld [vmem:[%s2638_s8 + $0x18] sm:$0xff] }
 0x47d   :  { %v1960_v19 = vunpack.i.h.bf16 %v1958_v9  ;;  %v1959_v26 = vunpack.i.l.bf16 %v1958_v9  ;;  %v1571_v9 = vld [vmem:[%s2638_s8 + $0x48] sm:$0xff] }
 0x47e   :  { %v1884_v23 = vpack.c.bf16 %v1571_v9, %v1570_v6 }
 0x47f   :  { %v832_v3 = vsel %vm830_vm9, %v829_v44, %v1960_v19  ;;  %v831_v58 = vsel %vm830_vm9, %v828_v7, %v1959_v26  ;;  %v1898_v44 = vpack.c.bf16 %v1243_v32, %v1242_v45 }
 0x480   :  { %v1963_v27 = vpop.permute.xlu1 %1962 }
 0x481   :  { %v1965_v20 = vunpack.i.h.bf16 %v1963_v27  ;;  %v1964_v35 = vunpack.i.l.bf16 %v1963_v27  ;;  %v1572_v27 = vld [vmem:[%s2638_s8 + $0x50] sm:$0xff] }
 0x482   :  { %v1888_v61 = vpack.c.bf16 %v1573_v47, %v1572_v27 }
 0x483   :  { %v834_v25 = vsel %vm833_vm10, %v831_v58, %v1964_v35  ;;  %v835_v30 = vsel %vm833_vm10, %v832_v3, %v1965_v20  ;;  %v1245_v3 = vld [vmem:[%s2638_s8 + $0x28] sm:$0x3] }
 0x485   :  { %v1968_v16 = vpop.permute.xlu0 %1967 }
 0x486   :  { %v1970_v4 = vunpack.i.h.bf16 %v1968_v16  ;;  %v1969_v24 = vunpack.i.l.bf16 %v1968_v16  ;;  %v1894_v16 = vpack.c.bf16 %v1241_v14, %v1240_v22 }
 0x488   :  { %v1973_v37 = vpop.permute.xlu1 %1972  ;;  %v838_v11 = vsel %vm836_vm11, %v835_v30, %v1970_v4  ;;  %v837_v36 = vsel %vm836_vm11, %v834_v25, %v1969_v24  ;;  %v1580_v25 = vld [vmem:[%s2638_s8 + $0x60] sm:$0xff]  ;;  %v1581_v30 = vld [vmem:[%s2638_s8 + $0x68] sm:$0xff] }
 0x489   :  { %v1975_v28 = vunpack.i.h.bf16 %v1973_v37  ;;  %v1974_v63 = vunpack.i.l.bf16 %v1973_v37 }
 0x48b   :  { %v841_v38 = vsel %vm839_vm12, %v838_v11, %v1975_v28  ;;  %v840_v41 = vsel %vm839_vm12, %v837_v36, %v1974_v63  ;;  %v1244_v63 = vld [vmem:[%s2638_s8 + $0x20] sm:$0xff]  ;;  %v1582_v11 = vld [vmem:[%s2638_s8 + $0x70] sm:$0xff] }
 0x48c   :  { %v1978_v31 = vpop.permute.xlu0 %1977  ;;  %v1902_v58 = vpack.c.bf16 %v1245_v3, %v1244_v63  ;;  %v1584_v36 = vld [vmem:[%s2638_s8 + $0x80] sm:$0xff] }
 0x48d   :  { %v1980_v15 = vunpack.i.h.bf16 %v1978_v31  ;;  %v1979_v34 = vunpack.i.l.bf16 %v1978_v31  ;;  %v1908_v31 = vpack.c.bf16 %v1581_v30, %v1580_v25 }
 0x48f   :  { %v843_v42 = vsel %vm842_vm13, %v840_v41, %v1979_v34  ;;  %v844_v17 = vsel %vm842_vm13, %v841_v38, %v1980_v15  ;;  %v1583_v15 = vld [vmem:[%s2638_s8 + $0x78] sm:$0xff]  ;;  %v1585_v38 = vld [vmem:[%s2638_s8 + $0x88] sm:$0x3]  ;;  %s2108_s8 = smov [#allocation5]  }
 0x490   :  { %1727 = vmatprep.mubr.f32.mxu1 %v843_v42  ;;  %v1912_v34 = vpack.c.bf16 %v1583_v15, %v1582_v11  ;;  %v1916_v41 = vpack.c.bf16 %v1585_v38, %v1584_v36  ;;  %v1589_v42 = vld [vmem:[%s2639_s9] ss:$0 sm:$0xff]  ;;  %s1535_s26 = sshll.u32 %s2108_s8, 4  ;;  %s1536_s26 = int_to_ptr.vmem [resolvable:$true] %s1535_s26 }
 0x491   :  { %1728 = vmatmul.mubr.f32.vlgmr.msra.gmra.mrb[4].mxu1 %v844_v17  ;;  %s2067_s27 = scalar_lea.vmem %s1536_s26, 256  ;;  %p2072_p9 = scmp.lt.s32.totalorder %s1536_s26, %s1536_s26 }
 0x492   :  { %p2068_p8 = scmp.ne.s32.totalorder %s1536_s26, %s2067_s27  ;;  %p2073_p10 = scmp.lt.s32.totalorder %s2067_s27, %s2067_s27 }
 0x494   :  { %p2074_p11 = por %p2073_p10, %p2072_p9 }
 0x496   :  { %p2075_p12 = pnand %p2074_p11, %p2068_p8 }
 0x564   :  { %v1729_v55 = vpop.f32.mrb[4].mxu1 }
 0x565   :  { %v981_v1 = vrot.slane %v1729_v55, 1  ;;  %v1148_v39 = vrot.slane %v1729_v55, 2  ;;  %v959_v52 = vpop.f32.mrb[5].mxu1 }
 0x566   :  { %v980_v21 = vrot.slane %v959_v52, 1  ;;  %v1147_v13 = vrot.slane %v959_v52, 2 }
 0x568   :  { %v982_v54 = vsel %vm979_vm2, %v980_v21, %v981_v1  ;;  %v1149_v10 = vsel %vm1146_vm14, %v1147_v13, %v1148_v39 }
 0x569   :  { %1738 = vmatprep.mubr.msk.f32.mxu0 %vm827_vm8, %v982_v54 }
 0x56a   :  { %1739 = vmatmul.mubr.msk.f32.vlgmr.msra.gmra.mrb[4].mxu0 %vm827_vm8, %v981_v1 }
 0x56b   :  { %1867 = vmatpush3.bf16.msra.mxu0 %v1864_v51  ;;  %1749 = vmatprep.mubr.msk.f32.mxu0 %vm827_vm8, %v959_v52 }
 0x56c   :  { %1869 = vmatprep.subr.bf16.mxu0 %v1868_v56 }
 0x56f   :  { %1871 = vmatpush3.bf16.msra.mxu0 %v1868_v56 }
 0x570   :  { %1873 = vmatprep.subr.bf16.mxu0 %v1872_v48 }
 0x572   :  { %1750 = vmatmul.mubr.msk.f32.vlgmr.msra.gmra.mrb[4].mxu0 %vm827_vm8, %v1729_v55 }
 0x573   :  { %1875 = vmatpush3.bf16.msra.mxu0 %v1872_v48  ;;  %1760 = vmatprep.mubr.msk.f32.mxu0 %vm827_vm8, %v1149_v10 }
 0x574   :  { %1877 = vmatprep.subr.bf16.mxu0 %v1876_v62 }
 0x577   :  { %1879 = vmatpush3.bf16.msra.mxu0 %v1876_v62 }
 0x578   :  { %1881 = vmatprep.subr.bf16.mxu0 %v1880_v5 }
 0x57a   :  { %1761 = vmatmul.mubr.msk.f32.vlgmr.msra.gmra.mrb[4].mxu0 %vm827_vm8, %v1148_v39 }
 0x57b   :  { %1883 = vmatpush3.bf16.msra.mxu0 %v1880_v5 }
 0x57c   :  { %1885 = vmatprep.subr.bf16.mxu0 %v1884_v23 }
 0x57f   :  { %1887 = vmatpush3.bf16.msra.mxu0 %v1884_v23 }
 0x580   :  { %1890 = vmatprep.subr.msk.bf16.mxu0 %vm2548_vm1, %v1888_v61 }
 0x583   :  { %1893 = vmatpush3.bf16.msk.msra.mxu0 %vm2548_vm1, %v1888_v61 }
 0x584   :  { %1895 = vmatprep.subr.bf16.mxu0 %v1894_v16 }
 0x64d   :  { %v1762_v33 = vpop.f32.mrb[4].mxu0 }
 0x64e   :  { %v1239_v19 = vadd.f32 %v1762_v33, %v1567_v18  ;;  %v1220_v26 = vpop.f32.mrb[5].mxu0 }
 0x64f   :  { %v1238_v37 = vadd.f32 %v1567_v18, %v1220_v26 }
 0x650   :  { %v1256_v20 = vrot.slane %v1239_v19, 1  ;;  %v1432_v35 = vrot.slane %v1239_v19, 2 }
 0x651   :  { %v1255_v4 = vrot.slane %v1238_v37, 1  ;;  %v1431_v24 = vrot.slane %v1238_v37, 2 }
 0x653   :  { %v1257_v7 = vsel %vm979_vm2, %v1255_v4, %v1256_v20  ;;  %v1433_v28 = vsel %vm1146_vm14, %v1431_v24, %v1432_v35 }
 0x654   :  { %1775 = vmatprep.mubr.msk.f32.mxu0 %vm1258_vm3, %v1257_v7 }
 0x655   :  { %1776 = vmatmul.mubr.msk.f32.vlgmr.msra.gmra.mrb[6].mxu0 %vm1258_vm3, %v1256_v20 }
 0x656   :  { %1897 = vmatpush3.bf16.msra.mxu0 %v1894_v16  ;;  %1790 = vmatprep.mubr.msk.f32.mxu0 %vm1258_vm3, %v1238_v37 }
 0x657   :  { %1899 = vmatprep.subr.bf16.mxu0 %v1898_v44 }
 0x65a   :  { %1901 = vmatpush3.bf16.msra.mxu0 %v1898_v44 }
 0x65b   :  { %1904 = vmatprep.subr.msk.bf16.mxu0 %vm2548_vm1, %v1902_v58 }
 0x65e   :  { %1907 = vmatpush3.bf16.msk.msra.mxu0 %vm2548_vm1, %v1902_v58 }
 0x65f   :  { %1909 = vmatprep.subr.bf16.mxu0 %v1908_v31 }
 0x661   :  { %1791 = vmatmul.mubr.msk.f32.vlgmr.msra.gmra.mrb[6].mxu0 %vm1258_vm3, %v1239_v19 }
 0x662   :  { %1911 = vmatpush3.bf16.msra.mxu0 %v1908_v31  ;;  %1805 = vmatprep.mubr.msk.f32.mxu0 %vm1258_vm3, %v1433_v28 }
 0x663   :  { %1913 = vmatprep.subr.bf16.mxu0 %v1912_v34 }
 0x666   :  { %1915 = vmatpush3.bf16.msra.mxu0 %v1912_v34 }
 0x667   :  { %1918 = vmatprep.subr.msk.bf16.mxu0 %vm2548_vm1, %v1916_v41 }
 0x66a   :  { %1921 = vmatpush3.bf16.msk.msra.mxu0 %vm2548_vm1, %v1916_v41 }
 0x66d   :  { %1806 = vmatmul.mubr.msk.f32.vlgmr.msra.gmra.mrb[6].mxu0 %vm1258_vm3, %v1432_v35 }
 0x740   :  { %v1807_v17 = vpop.f32.mrb[6].mxu0 }
 0x741   :  { %v1526_v43 = vadd.f32 %v1807_v17, %v1589_v42  ;;  %v1507_v46 = vpop.f32.mrb[7].mxu0 }
 0x742   :  { %v1525_v40 = vadd.f32 %v1589_v42, %v1507_v46 }
 0x743   :  { %1529 = vst.msk [vmem:[#allocation5 + $0x8] sm:$0xf] %vm1528_vm4, %v1526_v43 }
 0x744   :  { %1527 = vst.msk [vmem:[#allocation5] sm:$0xff] %vm830_vm9, %v1525_v40 }
 0x745   :  { %2078 = shalt.err (!%p2075_p12)
}
 0x746   :  { %s2079_s29 = scalar_lea.hbm %s2640_s10, 256 }
 0x747   :  { %p2080_p13 = scmp.ne.s32.totalorder %s2640_s10, %s2079_s29  ;;  %p2083_p0 = scmp.lt.u32.totalorder %s2079_s29, %s2640_s10 }
 0x749   :  { %p2085_p1 = pnand %p2083_p0, %p2080_p13 }
 0x74b   :  { %2088 = shalt.err (!%p2085_p1)
}
 0x74c   :  { %1541 = dma.vmem_to_hbm [thread:$0]  %s1536_s26, 256, %s2640_s10, [#allocation4], %s2094_s23, %s2094_s23, %s2095_s24  }
 0x74d   :  { %2091 = dma.done.wait [#allocation4], 256  }
 0x74e   :  { %2092 = vsyncadd [#allocation4], 4294967040 }
 0x74f   :  { %1545 = vsyncpa [#allocation3], 1 }
 0x750   :  { %1546 = vsyncpa [#allocation4], 1 }

</bundles_post_ra>
